<compile_context>
chip_gen: v7x
topology: tpu7x:2x2x1
jax: 0.10.0
libtpu: 0.0.40
codegen_flags: <defaults>
</compile_context>

<pallas_src>
import functools
import math

import jax
import jax.numpy as jnp
from jax import lax
from jax.experimental import pallas as pl
from jax.experimental.pallas import tpu as pltpu


def _xlogy_const(p: float) -> float:
    return 0.0 if p <= 0.0 else p * math.log(p)


def _pick_batch_tile(batch, lanes, itemsize, max_tile_rows=None):
    """Rows per batch tile: ~4 MiB of logp per tile, multiple of 32 sublanes."""
    target_bytes = 4 * 1024 * 1024
    rows = (target_bytes // max(1, lanes * itemsize)) // 32 * 32
    rows = max(32, min(1024, rows))
    if max_tile_rows is not None:
        rows = max(32, min(rows, (max_tile_rows // 32) * 32))
    if batch <= rows:
        return batch            # single tile covering the whole batch
    return rows


def _kl_ls_partial_kernel(logp_ref, sel_ref, out_ref, *,
                          smoothing, confidence, batch, tile_rows):
    """Per-tile partial of sum(t * logp), reduced over the batch (sublane) axis.

    logp_ref : (TB, K*G)  native dtype  -- log-probabilities, lane-dense
    sel_ref  : (TB, K*G)  int8          -- 1 where target[b,g] == k, else 0
    out_ref  : (1, 1, K*G) f32          -- per-lane-column partial sums
    """
    lp = logp_ref[...].astype(jnp.float32)                    # cast in-kernel

    # Mask out-of-range rows of the last (partial) tile. Trace-time branch:
    # only emitted when the batch doesn't divide the tile.
    if batch % tile_rows != 0:
        row = lax.broadcasted_iota(jnp.int32, lp.shape, 0)
        valid = (pl.program_id(0) * tile_rows + row) < batch
        lp = jnp.where(valid, lp, 0.0)

    sel_f = sel_ref[...].astype(jnp.float32)                  # 0/1 selection

    # Sublane-direction reductions only (VALU); cross-lane sum happens once in
    # the wrapper over the tiny partials array.
    col_sel = jnp.sum(lp * sel_f, axis=0, keepdims=True)      # (1, K*G)
    if smoothing == 0.0:
        # Guard against 0 * (-inf): zero-probability entries contribute 0.
        partial = confidence * col_sel
    else:
        col_all = jnp.sum(lp, axis=0, keepdims=True)          # (1, K*G)
        partial = smoothing * col_all + (confidence - smoothing) * col_sel

    out_ref[...] = partial[None]                               # (1, 1, K*G)


def goal_label_smoothing_loss(output, target, *, label_smoothing,
                              num_goal_buckets, max_tile_rows=None):
    """output: (B, K, G) log-probs (any float dtype);  target: (B, G) int."""
    B, K, G = output.shape
    assert K == num_goal_buckets
    KG = K * G
    smoothing = label_smoothing / num_goal_buckets
    confidence = 1.0 - label_smoothing

    # Compile-time constant: sum over all elements of xlogy(t, t).
    const_term = float(B * G) * (_xlogy_const(confidence)
                                 + (K - 1) * _xlogy_const(smoothing))

    # Lane-dense flat view of the log-probs (free, contiguous reshape) and a
    # lane-aligned int8 one-hot selection mask (tiny XLA op in the wrapper).
    logp2 = output.reshape(B, KG)                              # native dtype
    sel = (target[:, None, :].astype(jnp.int32) ==
           jnp.arange(K, dtype=jnp.int32)[None, :, None]).astype(jnp.int8)
    sel = sel.reshape(B, KG)                                   # i = k*G + g

    TB = _pick_batch_tile(B, KG, jnp.dtype(logp2.dtype).itemsize, max_tile_rows)
    ntiles = pl.cdiv(B, TB)

    tile_bytes = TB * KG * (jnp.dtype(logp2.dtype).itemsize + 1)
    vmem_limit = int(min(64 * 2**20, max(16 * 2**20, 4 * tile_bytes + (2 << 20))))

    kernel = functools.partial(
        _kl_ls_partial_kernel,
        smoothing=float(smoothing),
        confidence=float(confidence),
        batch=B,
        tile_rows=TB,
    )

    partials = pl.pallas_call(
        kernel,
        out_shape=jax.ShapeDtypeStruct((ntiles, 1, KG), jnp.float32),
        grid=(ntiles,),
        in_specs=[
            pl.BlockSpec((TB, KG), lambda i: (i, 0)),          # logp tile
            pl.BlockSpec((TB, KG), lambda i: (i, 0)),          # int8 one-hot
        ],
        out_specs=pl.BlockSpec((1, 1, KG), lambda i: (i, 0, 0)),
        compiler_params=pltpu.CompilerParams(
            dimension_semantics=("parallel",),
            vmem_limit_bytes=vmem_limit,
        ),
    )(logp2, sel)

    # loss = sum(xlogy(t,t)) - sum(t * logp); tiny final reduction in XLA.
    return jnp.float32(const_term) - jnp.sum(partials)


def _reference_loss(output, target, *, label_smoothing, num_goal_buckets):
    """Pure-JAX reference matching the PyTorch forward."""
    B, K, G = output.shape
    smoothing = label_smoothing / num_goal_buckets
    confidence = 1.0 - label_smoothing
    model_prob = jnp.full((B, K, G), smoothing, jnp.float32)
    b_idx = jnp.arange(B)[:, None]
    g_idx = jnp.arange(G)[None, :]
    model_prob = model_prob.at[b_idx, target, g_idx].set(confidence)
    t = model_prob
    safe_t = jnp.where(t > 0, t, 1.0)
    return jnp.sum(jnp.where(t > 0, t * jnp.log(safe_t), 0.0)
                   - t * output.astype(jnp.float32))


if __name__ == "__main__":
    label_smoothing = 0.1
    num_goal_buckets = 8   # K
    num_goals = 16         # G

    key = jax.random.PRNGKey(0)
    k1, k2, k3, k4 = jax.random.split(key, 4)

    # --- Case 1: module-consistent small shape (single tile path) ---
    B = 2
    logits = jax.random.normal(k1, (B, num_goal_buckets, num_goals), jnp.float32)
    output = jax.nn.log_softmax(logits, axis=1)    # log-probs over bucket axis
    target = jax.random.randint(k2, (B, num_goals), 0, num_goal_buckets,
                                dtype=jnp.int32)

    loss = goal_label_smoothing_loss(
        output, target,
        label_smoothing=label_smoothing, num_goal_buckets=num_goal_buckets)
    loss = jax.block_until_ready(loss)
    ref = _reference_loss(
        output, target,
        label_smoothing=label_smoothing, num_goal_buckets=num_goal_buckets)
    assert jnp.allclose(loss, ref, rtol=1e-5, atol=1e-4), (loss, ref)

    # --- Case 2: exercise the multi-tile grid + partial-tile masking path ---
    B2 = 80
    logits2 = jax.random.normal(k3, (B2, num_goal_buckets, num_goals), jnp.float32)
    output2 = jax.nn.log_softmax(logits2, axis=1)
    target2 = jax.random.randint(k4, (B2, num_goals), 0, num_goal_buckets,
                                 dtype=jnp.int32)

    loss2 = goal_label_smoothing_loss(
        output2, target2,
        label_smoothing=label_smoothing, num_goal_buckets=num_goal_buckets,
        max_tile_rows=32)                            # grid=(3,), last tile masked
    loss2 = jax.block_until_ready(loss2)
    ref2 = _reference_loss(
        output2, target2,
        label_smoothing=label_smoothing, num_goal_buckets=num_goal_buckets)
    assert jnp.allclose(loss2, ref2, rtol=1e-5, atol=1e-3), (loss2, ref2)

    print("KERNEL_OK")
</pallas_src>

<mosaic_0001>
module attributes {stable_mosaic.version = 11 : i64} {
  func.func @_kl_ls_partial_kernel(%arg0: i32, %arg1: memref<2x128xf32, #tpu.memory_space<vmem>>, %arg2: memref<2x128xi8, #tpu.memory_space<vmem>>, %arg3: memref<1x1x128xf32, #tpu.memory_space<vmem>>) attributes {dimension_semantics = [#tpu.dimension_semantics<parallel>], iteration_bounds = array<i64: 1>, scalar_prefetch = 0 : i64, scratch_operands = 0 : i64, tpu.core_type = #tpu.core_type<tc>, window_params = [{transform_indices = @transform_0, window_bounds = array<i64: 2, 128>}, {transform_indices = @transform_1, window_bounds = array<i64: 2, 128>}, {transform_indices = @transform_2, window_bounds = array<i64: 1, 1, 128>}]} {
    %c0 = arith.constant 0 : index
    %c0_0 = arith.constant 0 : index
    %0 = vector.load %arg1[%c0, %c0_0] : memref<2x128xf32, #tpu.memory_space<vmem>>, vector<2x128xf32>
    %c0_1 = arith.constant 0 : index
    %c0_2 = arith.constant 0 : index
    %1 = vector.load %arg2[%c0_1, %c0_2] : memref<2x128xi8, #tpu.memory_space<vmem>>, vector<2x128xi8>
    %2 = arith.sitofp %1 : vector<2x128xi8> to vector<2x128xf32>
    %3 = arith.mulf %0, %2 : vector<2x128xf32>
    %cst = arith.constant dense<0.000000e+00> : vector<128xf32>
    %4 = vector.multi_reduction <add>, %3, %cst [0] : vector<2x128xf32> to vector<128xf32>
    %5 = vector.shape_cast %4 : vector<128xf32> to vector<1x128xf32>
    %cst_3 = arith.constant dense<0.000000e+00> : vector<128xf32>
    %6 = vector.multi_reduction <add>, %0, %cst_3 [0] : vector<2x128xf32> to vector<128xf32>
    %7 = vector.shape_cast %6 : vector<128xf32> to vector<1x128xf32>
    %cst_4 = arith.constant 1.250000e-02 : f32
    %8 = vector.broadcast %cst_4 : f32 to vector<1x128xf32>
    %9 = arith.mulf %8, %7 : vector<1x128xf32>
    %cst_5 = arith.constant 0.887499988 : f32
    %10 = vector.broadcast %cst_5 : f32 to vector<1x128xf32>
    %11 = arith.mulf %10, %5 : vector<1x128xf32>
    %12 = arith.addf %9, %11 : vector<1x128xf32>
    %13 = vector.shape_cast %12 : vector<1x128xf32> to vector<1x1x128xf32>
    %c0_6 = arith.constant 0 : index
    %c0_7 = arith.constant 0 : index
    %c0_8 = arith.constant 0 : index
    %14 = vector.load %arg3[%c0_6, %c0_7, %c0_8] : memref<1x1x128xf32, #tpu.memory_space<vmem>>, vector<1x1x128xf32>
    tpu.vector_store %arg3[%c0_6, %c0_7, %c0_8], %13 {strides = array<i32>} : memref<1x1x128xf32, #tpu.memory_space<vmem>>, vector<1x1x128xf32>,
    return
  }
  func.func @transform_0(%arg0: i32) -> (i32, i32) {
    %c0_i32 = arith.constant 0 : i32
    %c0_i32_0 = arith.constant 0 : i32
    return %arg0, %c0_i32 : i32, i32
  }
  func.func @transform_1(%arg0: i32) -> (i32, i32) {
    %c0_i32 = arith.constant 0 : i32
    %c0_i32_0 = arith.constant 0 : i32
    return %arg0, %c0_i32 : i32, i32
  }
  func.func @transform_2(%arg0: i32) -> (i32, i32, i32) {
    %c0_i32 = arith.constant 0 : i32
    %c0_i32_0 = arith.constant 0 : i32
    %c0_i32_1 = arith.constant 0 : i32
    return %arg0, %c0_i32, %c0_i32_0 : i32, i32, i32
  }
}

</mosaic_0001>

<bundles_post_ra>
// kernel: tpu_custom_call.1
= control target key start
LH: loop header
LB: loop body
LE: loop exit
PB: predicated region body
PF: predicated region fallthrough
CT: control target
= control target key end

     0   :  { %7 = vsyncpa [#allocation3], 0  ;;  %s157_s0 = inlined_call_operand.hbm [shape: f32[2,128], index: 0, kind: input, shape index: {}]   ;;  %s158_s1 = inlined_call_operand.vmem [shape: s8[2,128], index: 1, kind: input, shape index: {}]   ;;  %s159_s2 = inlined_call_operand.hbm [shape: f32[1,1,128], index: 2, kind: output, shape index: {}]  }
   0x1   :  { %8 = vsyncpa [#allocation4], 0  ;;  %s113_s9 = smov [#allocation2]   ;;  %s65_s13 = scalar_lea.hbm %s157_s0, 32 }
   0x2   :  { %s15_s10 = sshll.u32 %s113_s9, 4  ;;  %p66_p0 = scmp.ne.s32.totalorder %s157_s0, %s65_s13  ;;  %s16_s10 = int_to_ptr.vmem [resolvable:$true] %s15_s10 }
   0x3   :  { %p69_p1 = scmp.lt.u32.totalorder %s65_s13, %s157_s0 }
   0x5   :  { %p71_p2 = pnand %p69_p1, %p66_p0 }
   0x7   :  { %74 = shalt.err (!%p71_p2)
}
   0x8   :  { %s75_s18 = scalar_lea.vmem %s16_s10, 32  ;;  %p80_p4 = scmp.lt.s32.totalorder %s16_s10, %s16_s10 }
   0x9   :  { %p76_p3 = scmp.ne.s32.totalorder %s16_s10, %s75_s18  ;;  %p81_p5 = scmp.lt.s32.totalorder %s75_s18, %s75_s18 }
   0xb   :  { %p82_p6 = por %p81_p5, %p80_p4 }
   0xd   :  { %p83_p7 = pnand %p82_p6, %p76_p3 }
   0xf   :  { %86 = shalt.err (!%p83_p7)
}
  0x10   :  { %18 = dma.hbm_to_vmem [thread:$0]  %s157_s0, 32, %s16_s10, [#allocation3]  }
  0x11   :  { %109 = dma.done.wait [#allocation3], 32  }
  0x12   :  { %110 = vsyncadd [#allocation3], 4294967264  ;;  %vm29_vm0 = vcmask 1041408   ;;  %v24_v0 = vld [vmem:[#allocation2] sm:$0x3]  ;;  %s114_s0 = smov [#allocation5]  }
  0x13   :  { %v25_v1 = vld [vmem:[%s158_s1] sm:$0x1]  ;;  %v37_v3 = vsel %vm29_vm0, %v24_v0, 0.0  ;;  %s54_s1 = sshll.u32 %s114_s0, 4  ;;  %s55_s1 = int_to_ptr.vmem [resolvable:$true] %s54_s1 }
  0x14   :  { %v26_v2 = vunpack.c.0.s8 %v25_v1  ;;  %v38_v4 = vrot.slane %v37_v3, 4  ;;  %s87_s23 = scalar_lea.vmem %s55_s1, 16  ;;  %s91_s24 = scalar_lea.vmem %s55_s1, 32 }
  0x15   :  { %p88_p8 = scmp.ne.s32.totalorder %s55_s1, %s87_s23  ;;  %p92_p9 = scmp.lt.s32.totalorder %s55_s1, %s55_s1 }
  0x16   :  { %v27_v5 = vcvt.s32.f32 %v26_v2  ;;  %v39_v6 = vadd.f32 %v38_v4, %v37_v3  ;;  %p93_p10 = scmp.lt.s32.totalorder %s91_s24, %s87_s23 }
  0x18   :  { %v28_v7 = vmul.f32 %v27_v5, %v24_v0  ;;  %v40_v8 = vrot.slane %v39_v6, 2  ;;  %p94_p11 = por %p93_p10, %p92_p9 }
  0x1a   :  { %v30_v9 = vsel %vm29_vm0, %v28_v7, 0.0  ;;  %v41_v11 = vadd.f32 %v40_v8, %v39_v6  ;;  %p95_p12 = pnand %p94_p11, %p88_p8 }
  0x1b   :  { %v31_v10 = vrot.slane %v30_v9, 4 }
  0x1c   :  { %v42_v13 = vrot.slane %v41_v11, 1 }
  0x1d   :  { %v32_v12 = vadd.f32 %v31_v10, %v30_v9 }
  0x1e   :  { %v43_v16 = vadd.f32 %v42_v13, %v41_v11 }
  0x1f   :  { %v33_v14 = vrot.slane %v32_v12, 2 }
  0x20   :  { %v44_v19 = vmul.f32 0.0125, %v43_v16 }
  0x21   :  { %v34_v15 = vadd.f32 %v33_v14, %v32_v12 }
  0x23   :  { %v35_v17 = vrot.slane %v34_v15, 1 }
  0x25   :  { %v36_v18 = vadd.f32 %v35_v17, %v34_v15 }
  0x27   :  { %v45_v20 = vmul.f32 0.8875, %v36_v18 }
  0x29   :  { %v46_v21 = vadd.f32 %v45_v20, %v44_v19 }
  0x2b   :  { %47 = vst [vmem:[#allocation5] sm:$0x1] %v46_v21 }
  0x2c   :  { %98 = shalt.err (!%p95_p12)
}
  0x2d   :  { %s99_s27 = scalar_lea.hbm %s159_s2, 16 }
  0x2e   :  { %p100_p13 = scmp.ne.s32.totalorder %s159_s2, %s99_s27  ;;  %p103_p0 = scmp.lt.u32.totalorder %s99_s27, %s159_s2 }
  0x30   :  { %p105_p1 = pnand %p103_p0, %p100_p13 }
  0x32   :  { %108 = shalt.err (!%p105_p1)
}
  0x33   :  { %57 = dma.vmem_to_hbm [thread:$0]  %s55_s1, 16, %s159_s2, [#allocation4]  }
  0x34   :  { %111 = dma.done.wait [#allocation4], 16  }
  0x35   :  { %112 = vsyncadd [#allocation4], 4294967280 }
  0x36   :  { %61 = vsyncpa [#allocation3], 1 }
  0x37   :  { %62 = vsyncpa [#allocation4], 1 }

</bundles_post_ra>
